<compile_context>
chip_gen: v5e
topology: v5e:2x2
jax: 0.10.0
libtpu: 0.0.40
codegen_flags: <defaults>
</compile_context>

<pallas_src>
import functools

import jax
import jax.numpy as jnp
from jax.experimental import pallas as pl
from jax.experimental.pallas import tpu as pltpu


def _se_kernel(x_ref, w1t_ref, w2t_ref, out_ref, *, inv_hw):
    """SE block for a (Bt, C, HWp) slab, fully VMEM-resident.

    x_ref   : (Bt, C, HWp) f32 input slab (lane axis = padded H*W)
    w1t_ref : (C, Cr)      fc1 weight, transposed to (in_features, out_features)
    w2t_ref : (Cr, C)      fc2 weight, transposed to (in_features, out_features)
    out_ref : (Bt, C, HWp) rescaled output
    """
    # Global average pool over the spatial (lane) axis.  Padded lanes are zero,
    # so multiplying the sum by 1/(true H*W) gives the exact mean.
    pooled = jnp.sum(x_ref[...], axis=-1) * inv_hw           # (Bt, C)

    # Batched fc1 (bias=False) + ReLU, then fc2 (bias=False) + sigmoid.
    h = jnp.dot(pooled, w1t_ref[...], preferred_element_type=jnp.float32)
    h = jnp.maximum(h, 0.0)                                  # (Bt, Cr)
    y = jnp.dot(h, w2t_ref[...], preferred_element_type=jnp.float32)
    s = 1.0 / (1.0 + jnp.exp(-y))                            # (Bt, C)

    # Per-channel rescale.  Re-read x_ref here (fresh VMEM load, short live
    # range) and broadcast s across the lane axis; lane-dense unmasked store.
    out_ref[...] = x_ref[...] * s[:, :, None]


def _round_up(n, m):
    return ((n + m - 1) // m) * m


def _pick_bt(B, C, HWp, itemsize=4, block_budget_bytes=40 * 1024 * 1024):
    """Largest divisor of B whose per-step footprint fits the VMEM budget and,
    when B >= 2, keeps the grid length >= 2 (v7x has two TensorCores)."""
    # Per batch element per step: input + output block, each double-buffered.
    per_b = 2 * 2 * C * HWp * itemsize
    bt_vmem = max(1, block_budget_bytes // per_b)
    bt_cap = min(bt_vmem, B if B < 2 else max(1, B // 2))
    for bt in range(min(bt_cap, B), 0, -1):
        if B % bt == 0:
            return bt
    return 1


@jax.jit
def se_block_forward(x_nchw, w1, w2):
    """x_nchw: (B, C, H, W) f32.  w1: (C//r, C), w2: (C, C//r) (PyTorch layout)."""
    B, C, H, W = x_nchw.shape
    Cr = w1.shape[0]
    HW = H * W
    HWp = _round_up(HW, 128)                 # lane-dense output layout

    x3 = x_nchw.reshape(B, C, HW)            # contiguous -> free reshape
    if HWp != HW:
        x3 = jnp.pad(x3, ((0, 0), (0, 0), (0, HWp - HW)))

    Bt = _pick_bt(B, C, HWp)
    grid = (B // Bt,)

    # Transpose weights once in the wrapper so the in-kernel FCs are plain
    # row-major batched matmuls over the pooled rows.
    w1t = w1.T                               # (C, Cr)
    w2t = w2.T                               # (Cr, C)

    kernel = functools.partial(_se_kernel, inv_hw=1.0 / HW)

    out3 = pl.pallas_call(
        kernel,
        out_shape=jax.ShapeDtypeStruct((B, C, HWp), jnp.float32),
        grid=grid,
        in_specs=[
            pl.BlockSpec((Bt, C, HWp), lambda b: (b, 0, 0)),   # batched slab
            pl.BlockSpec((C, Cr), lambda b: (0, 0)),           # fc1^T (resident)
            pl.BlockSpec((Cr, C), lambda b: (0, 0)),           # fc2^T (resident)
        ],
        out_specs=pl.BlockSpec((Bt, C, HWp), lambda b: (b, 0, 0)),
        compiler_params=pltpu.CompilerParams(
            dimension_semantics=("parallel",),
            vmem_limit_bytes=48 * 1024 * 1024,
        ),
    )(x3, w1t, w2t)

    if HWp != HW:
        out3 = out3[:, :, :HW]
    return out3.reshape(B, C, H, W)


def _reference_forward(x, w1, w2):
    """Pure-JAX reference matching the PyTorch se_block forward."""
    pooled = jnp.mean(x, axis=(2, 3))                  # (B, C)
    h = jax.nn.relu(pooled @ w1.T)                     # (B, C//r)
    s = jax.nn.sigmoid(h @ w2.T)                       # (B, C)
    return x * s[:, :, None, None]


if __name__ == "__main__":
    # Small shapes consistent with the module: batch=2, in_channel=4, ratio=4,
    # spatial 16x16  ->  fc1: 4 -> 1, fc2: 1 -> 4.
    B, C, H, W = 2, 4, 16, 16
    ratio = 4
    Cr = C // ratio

    key = jax.random.PRNGKey(0)
    kx, k1, k2 = jax.random.split(key, 3)

    x = jax.random.normal(kx, (B, C, H, W), dtype=jnp.float32)

    # PyTorch nn.Linear default init: U(-1/sqrt(fan_in), 1/sqrt(fan_in)), bias=False.
    bound1 = 1.0 / (C ** 0.5)
    w1 = jax.random.uniform(k1, (Cr, C), jnp.float32, -bound1, bound1)
    bound2 = 1.0 / (Cr ** 0.5)
    w2 = jax.random.uniform(k2, (C, Cr), jnp.float32, -bound2, bound2)

    out = jax.block_until_ready(se_block_forward(x, w1, w2))

    ref = _reference_forward(x, w1, w2)
    assert out.shape == (B, C, H, W)
    assert jnp.allclose(out, ref, atol=1e-5, rtol=1e-5), \
        f"max err {jnp.max(jnp.abs(out - ref))}"

    print("KERNEL_OK")
</pallas_src>

<mosaic_0001>
module attributes {stable_mosaic.version = 11 : i64} {
  func.func @_se_kernel(%arg0: i32, %arg1: memref<1x4x256xf32, #tpu.memory_space<vmem>>, %arg2: memref<4x1xf32, #tpu.memory_space<vmem>>, %arg3: memref<1x4xf32, #tpu.memory_space<vmem>>, %arg4: memref<1x4x256xf32, #tpu.memory_space<vmem>>) attributes {dimension_semantics = [#tpu.dimension_semantics<parallel>], iteration_bounds = array<i64: 2>, scalar_prefetch = 0 : i64, scratch_operands = 0 : i64, tpu.core_type = #tpu.core_type<tc>, window_params = [{transform_indices = @transform_0, window_bounds = array<i64: 1, 4, 256>}, {pipeline_mode = #tpu.pipeline_mode<synchronous>, transform_indices = @transform_1, window_bounds = array<i64: 4, 1>}, {pipeline_mode = #tpu.pipeline_mode<synchronous>, transform_indices = @transform_2, window_bounds = array<i64: 1, 4>}, {transform_indices = @transform_3, window_bounds = array<i64: 1, 4, 256>}]} {
    %c0 = arith.constant 0 : index
    %c0_0 = arith.constant 0 : index
    %c0_1 = arith.constant 0 : index
    %0 = vector.load %arg1[%c0, %c0_0, %c0_1] : memref<1x4x256xf32, #tpu.memory_space<vmem>>, vector<1x4x256xf32>
    %cst = arith.constant dense<0.000000e+00> : vector<1x4xf32>
    %1 = vector.multi_reduction <add>, %0, %cst [2] : vector<1x4x256xf32> to vector<1x4xf32>
    %cst_2 = arith.constant 3.906250e-03 : f32
    %2 = vector.broadcast %cst_2 : f32 to vector<1x4xf32>
    %3 = arith.mulf %1, %2 : vector<1x4xf32>
    %c0_3 = arith.constant 0 : index
    %c0_4 = arith.constant 0 : index
    %4 = vector.load %arg2[%c0_3, %c0_4] : memref<4x1xf32, #tpu.memory_space<vmem>>, vector<4x1xf32>
    %cst_5 = arith.constant dense<0.000000e+00> : vector<1x1xf32>
    %5 = tpu.matmul %3, %4, %cst_5 {dimension_numbers = #tpu.dot_dimension_numbers<[1], [0], [0], [1], [0, 0, 1, 1], [], []>} : vector<1x4xf32>, vector<4x1xf32>, vector<1x1xf32> -> vector<1x1xf32>
    %cst_6 = arith.constant 0.000000e+00 : f32
    %6 = vector.broadcast %cst_6 : f32 to vector<1x1xf32>
    %7 = arith.maximumf %5, %6 : vector<1x1xf32>
    %c0_7 = arith.constant 0 : index
    %c0_8 = arith.constant 0 : index
    %8 = vector.load %arg3[%c0_7, %c0_8] : memref<1x4xf32, #tpu.memory_space<vmem>>, vector<1x4xf32>
    %cst_9 = arith.constant dense<0.000000e+00> : vector<1x4xf32>
    %9 = tpu.matmul %7, %8, %cst_9 {dimension_numbers = #tpu.dot_dimension_numbers<[1], [0], [0], [1], [0, 0, 1, 1], [], []>} : vector<1x1xf32>, vector<1x4xf32>, vector<1x4xf32> -> vector<1x4xf32>
    %cst_10 = arith.constant 0.000000e+00 : f32
    %10 = vector.broadcast %cst_10 : f32 to vector<1x4xf32>
    %11 = arith.subf %10, %9 : vector<1x4xf32>
    %12 = math.exp %11 : vector<1x4xf32>
    %cst_11 = arith.constant 1.000000e+00 : f32
    %13 = vector.broadcast %cst_11 : f32 to vector<1x4xf32>
    %14 = arith.addf %13, %12 : vector<1x4xf32>
    %cst_12 = arith.constant 1.000000e+00 : f32
    %15 = vector.broadcast %cst_12 : f32 to vector<1x4xf32>
    %16 = arith.divf %15, %14 : vector<1x4xf32>
    %c0_13 = arith.constant 0 : index
    %c0_14 = arith.constant 0 : index
    %c0_15 = arith.constant 0 : index
    %17 = vector.load %arg1[%c0_13, %c0_14, %c0_15] : memref<1x4x256xf32, #tpu.memory_space<vmem>>, vector<1x4x256xf32>
    %18 = vector.shape_cast %16 : vector<1x4xf32> to vector<1x4x1xf32>
    %19 = vector.broadcast %18 : vector<1x4x1xf32> to vector<1x4x256xf32>
    %20 = arith.mulf %17, %19 : vector<1x4x256xf32>
    %c0_16 = arith.constant 0 : index
    %c0_17 = arith.constant 0 : index
    %c0_18 = arith.constant 0 : index
    %21 = vector.load %arg4[%c0_16, %c0_17, %c0_18] : memref<1x4x256xf32, #tpu.memory_space<vmem>>, vector<1x4x256xf32>
    tpu.vector_store %arg4[%c0_16, %c0_17, %c0_18], %20 {strides = array<i32>} : memref<1x4x256xf32, #tpu.memory_space<vmem>>, vector<1x4x256xf32>,
    return
  }
  func.func @transform_0(%arg0: i32) -> (i32, i32, i32) {
    %c0_i32 = arith.constant 0 : i32
    %c0_i32_0 = arith.constant 0 : i32
    %c0_i32_1 = arith.constant 0 : i32
    return %arg0, %c0_i32, %c0_i32_0 : i32, i32, i32
  }
  func.func @transform_1(%arg0: i32) -> (i32, i32) {
    %c0_i32 = arith.constant 0 : i32
    %c0_i32_0 = arith.constant 0 : i32
    %c0_i32_1 = arith.constant 0 : i32
    return %c0_i32, %c0_i32_0 : i32, i32
  }
  func.func @transform_2(%arg0: i32) -> (i32, i32) {
    %c0_i32 = arith.constant 0 : i32
    %c0_i32_0 = arith.constant 0 : i32
    %c0_i32_1 = arith.constant 0 : i32
    return %c0_i32, %c0_i32_0 : i32, i32
  }
  func.func @transform_3(%arg0: i32) -> (i32, i32, i32) {
    %c0_i32 = arith.constant 0 : i32
    %c0_i32_0 = arith.constant 0 : i32
    %c0_i32_1 = arith.constant 0 : i32
    return %arg0, %c0_i32, %c0_i32_0 : i32, i32, i32
  }
}

</mosaic_0001>

<bundles_post_ra>
// kernel: se_block_forward.1
= control target key start
LH: loop header
LB: loop body
LE: loop exit
PB: predicated region body
PF: predicated region fallthrough
CT: control target
= control target key end

     0   :  { %s395_s12 = smov 0   ;;  %s425_s0 = inlined_call_operand.vmem [shape: f32[2,4,256], index: 0, kind: input, shape index: {}]   ;;  %s426_s1 = inlined_call_operand.vmem [shape: f32[4,1], index: 1, kind: input, shape index: {}]   ;;  %s427_s2 = inlined_call_operand.vmem [shape: f32[1,4], index: 2, kind: input, shape index: {}]   ;;  %s428_s3 = inlined_call_operand.vmem [shape: f32[2,4,256], index: 3, kind: output, shape index: {}]  }
   0x1 LB: > { %s335_s13 = sadd.s32 4294967295, %s372_s12   ;;  %p339_p0 = scmp.ge.s32.totalorder %s372_s12, 1  ;;  %s372_s12 = sphi %s395_s12, %s13_s12  }
   0x2   : > { %p137_p1 = scmp.lt.s32.totalorder %s372_s12, 3 }
   0x4   : > { %p138_p2 = pnand %p339_p0, %p137_p1 }
   0x5   : > { %p161_p3 = scmp.lt.s32.totalorder (!%p138_p2), %s335_s13, 1 }
   0x6   : > { %141 = sbr.rel (%p138_p2) target bundleno = 552 (0x228), region = 32 }
   0xb   : > { %s430_s13 = smov (!%p161_p3, %s335_s13), 1  ;;  %vm178_vm0 = vcmask 1043456   ;;  %v185_v6 = vld [vmem:[%s426_s1] sm:$0xf]  ;;  %v187_v7 = vlaneseq  ;;  %vm190_vm1 = vcmask 31744   ;;  %vm222_vm2 = vcmask 1040384  }
   0xc   : > { %s350_s14 = sshll.u32 %s430_s13, 3  ;;  %344 = vmatpush.msk.msra.mxu0 %vm178_vm0, %v185_v6  ;;  %v217_v12 = vld [vmem:[%s427_s2] sm:$0x1]  ;;  %vm218_vm3 = vcmask 7168   ;;  %v374_v32 = vmov 839922192  }
   0xd   : > { %s165_s17 = scalar_lea.vmem %s425_s0, %s350_s14  ;;  %v188_v8 = vand.u32 127, %v187_v7  ;;  %346 = vmatpush.msk.msra.mxu1 %vm222_vm2, %v217_v12  ;;  %v267_v15 = vshrl.u32 %v187_v7, 7  ;;  %v274_v33 = vunpack.c.l.s4 %v374_v32  ;;  %s170_s24 = scalar_lea.vmem %s428_s3, %s350_s14 }
   0xe   : > { %v171_v0 = vld [vmem:[%s165_s17] sm:$0xff] }
   0xf   : > { %173 = vst [vmem:[#allocation1] ss:$2 sm:$0xff] %v171_v0  ;;  %361 = vset.pattern.permute.xlu0 %v267_v15  ;;  %v275_v34 = vunpack.c.0.s8 %v274_v33 }
  0x16   : > { %v174_v1 = vld.sshfl [vmem:[#allocation1] sm:$0xff pattern:$0x75316420]  ;;  %v175_v2 = vld.sshfl [vmem:[#allocation1 + $0x8] sm:$0xff pattern:$0x75316420] }
  0x17   : > { %v179_v3 = vsel %vm178_vm0, %v174_v1, 0.0  ;;  %v180_v4 = vsel %vm178_vm0, %v175_v2, 0.0 }
  0x18   : > { %v181_v5 = vadd.f32 %v180_v4, %v179_v3 }
  0x1a   : > { %182 = vadd.xlane.f32.xlu0 %v181_v5 }
  0x8d   : > { %v183_v9 = vpop.xlane.xlu0 %182 }
  0x8e   : > { %v184_v10 = vmul.f32 0.00390625, %v183_v9 }
  0x90   : > { %v189_v11 = vperm.slane %v184_v10, %v188_v8 }
  0x92   : > { %345 = vmatmul.msk.f32.vlgmr.msra.gmra.mxu0 %vm190_vm1, %v189_v11 }
 0x10f   : > { %v213_v13 = vpop.f32.mrf.mxu0 }
 0x110   : > { %v216_v14 = vmax.f32 %v213_v13, 0.0 }
 0x112   : > { %347 = vmatmul.msk.f32.vlgmr.msra.gmra.mxu1 %vm218_vm3, %v216_v14 }
 0x18f   : > { %v243_v16 = vpop.f32.mrf.mxu1 }
 0x190   : > { %v246_v17 = vsub.f32 0.0, %v243_v16 }
 0x192   : > { %v247_v18 = vmul.f32 1.442695, %v246_v17 }
 0x194   : > { %362 = vpow2.f32 %v247_v18 }
 0x19a   : > { %v363_v19 = vpop.eup %362 }
 0x19b   : > { %v249_v20 = vadd.f32 1.0, %v363_v19 }
 0x19d   : > { %364 = vrcp.f32 %v249_v20  ;;  %v261_v24 = vand.u32 2147483648, %v249_v20  ;;  %v259_v26 = vand.u32 2147483647, %v249_v20  ;;  %vm255_vm5 = vweird.f32 %v249_v20 }
 0x19f   : > { %v262_v28 = vor.u32 1.1754944e-38, %v261_v24  ;;  %vm260_vm7 = vcmp.eq.f32.partialorder %v259_v26, 8.507059e+37 }
 0x1a3   : > { %v365_v21 = vpop.eup %364 }
 0x1a4   : > { %v251_v22 = vmul.f32 %v365_v21, %v249_v20  ;;  %vm256_vm4 = vweird.f32 %v365_v21 }
 0x1a5   : > { %vm257_vm6 = vmor %vm255_vm5, %vm256_vm4 }
 0x1a6   : > { %v252_v23 = vsub.f32 1.0, %v251_v22 }
 0x1a8   : > { %v253_v25 = vmul.f32 %v365_v21, %v252_v23 }
 0x1aa   : > { %v254_v27 = vadd.f32 %v365_v21, %v253_v25 }
 0x1ac   : > { %v258_v29 = vsel %vm257_vm6, %v365_v21, %v254_v27 }
 0x1ad   : > { %v263_v30 = vsel %vm260_vm7, %v262_v28, %v258_v29 }
 0x1ae   : > { %v265_v31 = vperm.slane %v263_v30, 0 }
 0x1b0   : > { %270 = vperm.xlu0 %361, %v265_v31  }
 0x222   : > { %v271_v35 = vpop.permute.xlu0 %270 }
 0x223   : > { %v276_v36 = vperm.slane %v271_v35, %v275_v34 }
 0x225   : > { %v278_v37 = vmul.f32 %v276_v36, %v171_v0 }
 0x227   : > { %279 = vst [vmem:[%s170_s24] sm:$0xff] %v278_v37 }
 0x228 PF: > { %s13_s12 = sadd.s32 1, %s372_s12  }
 0x229   : > { %p10_p4 = scmp.ge.s32.totalorder %s13_s12, 4  }
 0x22b   :  { %12 = sbr.rel (!%p10_p4) target bundleno = 1 (0x1), region = 62 }

</bundles_post_ra>
